<compile_context>
chip_gen: v6e
topology: v6e:2x2x1
jax: 0.10.0
libtpu: 0.0.40
codegen_flags: <defaults>
</compile_context>

<pallas_src>
import jax
import jax.numpy as jnp
from jax.experimental import pallas as pl
from jax.experimental.pallas import tpu as pltpu


# ---------------------------------------------------------------------------
# Pallas kernel: full LSTM recurrence + final projection + sigmoid
# ---------------------------------------------------------------------------
def lstm_final_kernel(x_ref, wih_ref, whh_ref, b_ref, wout_ref, bout_ref,
                      yhat_ref, gx_sc):
    T, Bb, D = x_ref.shape
    H = whh_ref.shape[0]
    G = 4 * H

    # --- Hoisted input projection: one (T*Bb, D) @ (D, 4H) MXU pass ---------
    # (layout-compatible reshape: lane dim D unchanged, leading dims collapse
    #  into the sublane axis)
    x_all = x_ref[...].reshape(T * Bb, D)                       # bf16
    gx = (jnp.dot(x_all, wih_ref[...], preferred_element_type=jnp.float32)
          + b_ref[...])                                         # f32 (T*Bb, 4H)
    gx_sc[...] = gx.reshape(T, Bb, G)

    w_hh = whh_ref[...]                                         # (H, 4H) bf16

    # --- Serial recurrence: only h @ W_hh + nonlinearities per step ---------
    def step(t, carry):
        h, c = carry                                            # (Bb, H) f32
        gates = gx_sc[t] + jnp.dot(h.astype(w_hh.dtype), w_hh,
                                   preferred_element_type=jnp.float32)
        # PyTorch gate order i, f, g, o.  One full-vreg sigmoid (EUP), then
        # cheap lane slices feeding VPU multiplies; gate math stays f32.
        sig = jax.nn.sigmoid(gates)
        i_g = sig[:, 0 * H:1 * H]
        f_g = sig[:, 1 * H:2 * H]
        o_g = sig[:, 3 * H:4 * H]
        g_g = jnp.tanh(gates[:, 2 * H:3 * H])
        c_new = f_g * c + i_g * g_g
        h_new = o_g * jnp.tanh(c_new)
        return h_new, c_new

    h0 = jnp.zeros((Bb, H), jnp.float32)                        # init_hidden()
    c0 = jnp.zeros((Bb, H), jnp.float32)
    h_T, _ = jax.lax.fori_loop(0, T, step, (h0, c0), unroll=True)

    # --- yhat = sigmoid(last_hidden @ W_out + b_out)  (self.final + sigmoid)
    logits = (jnp.dot(h_T.astype(wout_ref.dtype), wout_ref[...],
                      preferred_element_type=jnp.float32) + bout_ref[...])
    yhat_ref[...] = jax.nn.sigmoid(logits)


def run_lstm_final(embeds, w_ih, w_hh, b, w_out, b_out, *, b_block=8):
    """embeds: (T, B, D) f32.  Returns yhat: (B, Y) f32."""
    T, B, D = embeds.shape
    H = w_hh.shape[0]
    Y = w_out.shape[1]

    # Pad batch to a multiple of 8 sublanes (f32 minimum); padded rows run
    # through the recurrence on zero inputs and are discarded afterwards.
    b_block = max(8, b_block)
    B_pad = ((B + b_block - 1) // b_block) * b_block
    if B_pad != B:
        embeds = jnp.pad(embeds, ((0, 0), (0, B_pad - B), (0, 0)))
    n_blocks = B_pad // b_block

    yhat_pad = pl.pallas_call(
        lstm_final_kernel,
        out_shape=jax.ShapeDtypeStruct((B_pad, Y), jnp.float32),
        grid_spec=pltpu.PrefetchScalarGridSpec(
            num_scalar_prefetch=0,
            grid=(n_blocks,),                                   # batch blocks
            in_specs=[
                pl.BlockSpec((T, b_block, D), lambda bb: (0, bb, 0)),  # x
                pl.BlockSpec((D, 4 * H), lambda bb: (0, 0)),    # W_ih^T (bf16)
                pl.BlockSpec((H, 4 * H), lambda bb: (0, 0)),    # W_hh^T (bf16)
                pl.BlockSpec((1, 4 * H), lambda bb: (0, 0)),    # b_ih+b_hh
                pl.BlockSpec((H, Y), lambda bb: (0, 0)),        # final.W^T
                pl.BlockSpec((1, Y), lambda bb: (0, 0)),        # final.b
            ],
            out_specs=pl.BlockSpec((b_block, Y), lambda bb: (bb, 0)),
            scratch_shapes=[pltpu.VMEM((T, b_block, 4 * H), jnp.float32)],
        ),
        compiler_params=pltpu.CompilerParams(
            dimension_semantics=("parallel",)),  # batch blocks are independent
    )(embeds.astype(jnp.bfloat16),
      w_ih.astype(jnp.bfloat16),
      w_hh.astype(jnp.bfloat16),
      b.astype(jnp.float32),
      w_out.astype(jnp.bfloat16),
      b_out.astype(jnp.float32))
    return yhat_pad[:B]


# ---------------------------------------------------------------------------
# Forward wrapper (embedding gathers + loss are plain-JAX glue)
# ---------------------------------------------------------------------------
def vanilla_rnn_forward(params, x_word, x_pos, x_pid, target):
    # embed + torch-transpose chain collapses to: concat features, go seq-major
    e_word = jnp.take(params["embed_word"], x_word, axis=0)    # (B, T, E)
    e_pos = jnp.take(params["embed_pos"], x_pos, axis=0)       # (B, T, Ep)
    e_pid = jnp.take(params["embed_pid"], x_pid, axis=0)       # (B, T, E)
    embeds = jnp.concatenate([e_word, e_pos, e_pid], axis=-1)  # (B, T, D)
    embeds = jnp.transpose(embeds, (1, 0, 2)).astype(jnp.float32)  # (T, B, D)

    yhat = run_lstm_final(embeds, params["w_ih"], params["w_hh"], params["b"],
                          params["w_out"], params["b_out"])    # (B, Y)

    # F.binary_cross_entropy(yhat, target)  (mean reduction)
    eps = 1e-7
    yc = jnp.clip(yhat, eps, 1.0 - eps)
    loss = -jnp.mean(target * jnp.log(yc) + (1.0 - target) * jnp.log(1.0 - yc))
    return yhat, loss, None


# Pure-JAX reference (same bf16-input / f32-accumulate precision policy)
def _reference_yhat(params, embeds):
    H = params["w_hh"].shape[0]
    B = embeds.shape[1]
    w_ih = params["w_ih"].astype(jnp.bfloat16)
    w_hh = params["w_hh"].astype(jnp.bfloat16)
    w_out = params["w_out"].astype(jnp.bfloat16)
    x = embeds.astype(jnp.bfloat16)

    def step(carry, x_t):
        h, c = carry
        gates = (jnp.dot(x_t, w_ih, preferred_element_type=jnp.float32)
                 + jnp.dot(h.astype(jnp.bfloat16), w_hh,
                           preferred_element_type=jnp.float32)
                 + params["b"][0])
        i_g = jax.nn.sigmoid(gates[:, 0 * H:1 * H])
        f_g = jax.nn.sigmoid(gates[:, 1 * H:2 * H])
        g_g = jnp.tanh(gates[:, 2 * H:3 * H])
        o_g = jax.nn.sigmoid(gates[:, 3 * H:4 * H])
        c = f_g * c + i_g * g_g
        h = o_g * jnp.tanh(c)
        return (h, c), None

    h0 = jnp.zeros((B, H), jnp.float32)
    (h, _), _ = jax.lax.scan(step, (h0, h0), x)
    return jax.nn.sigmoid(
        jnp.dot(h.astype(jnp.bfloat16), w_out,
                preferred_element_type=jnp.float32) + params["b_out"][0])


# ---------------------------------------------------------------------------
# Deterministic parameter construction (shapes from VanillaRNN.__init__)
# ---------------------------------------------------------------------------
def make_params(key, vocab_size, pos_size, p_size, embed_size, embed_pos_dim,
                rnn_dim, Y):
    D = 2 * embed_size + embed_pos_dim   # word + pos + pid feature concat
    H = rnn_dim                          # num_directions == 1
    ks = jax.random.split(key, 8)
    k = 1.0 / jnp.sqrt(jnp.float32(H))

    def u(kk, shape, scale):
        return jax.random.uniform(kk, shape, jnp.float32, -scale, scale)

    return dict(
        embed_word=jax.random.normal(ks[0], (vocab_size + 2, embed_size),
                                     jnp.float32),
        embed_pos=jax.random.normal(ks[1], (pos_size, embed_pos_dim),
                                    jnp.float32),
        embed_pid=jax.random.normal(ks[2], (p_size, embed_size), jnp.float32),
        w_ih=u(ks[3], (D, 4 * H), k),          # stored transposed: x @ W
        w_hh=u(ks[4], (H, 4 * H), k),
        b=u(ks[5], (1, 4 * H), k),             # b_ih + b_hh combined
        w_out=u(ks[6], (H, Y), k),             # final.Linear, transposed
        b_out=u(ks[7], (1, Y), k),
    )


if __name__ == "__main__":
    B, T = 8, 8                 # batch (>= 8 sublanes), sequence length
    E, EP = 32, 8               # embed_size, embed_pos dim
    H = 32                      # rnn_dim (unidirectional, 1 layer) -> 4H = 128
    Y = 16                      # number of labels
    VOCAB, POS_SIZE, P_SIZE = 50, 24, 50

    key = jax.random.PRNGKey(0)
    kp, kw, kpos, kpid, kt = jax.random.split(key, 5)

    params = make_params(kp, VOCAB, POS_SIZE, P_SIZE, E, EP, H, Y)

    x_word = jax.random.randint(kw, (B, T), 0, VOCAB + 2, jnp.int32)
    x_pos = jax.random.randint(kpos, (B, T), 0, POS_SIZE, jnp.int32)
    x_pid = jax.random.randint(kpid, (B, T), 0, P_SIZE, jnp.int32)
    target = jax.random.bernoulli(kt, 0.3, (B, Y)).astype(jnp.float32)

    yhat, loss, _ = jax.block_until_ready(
        vanilla_rnn_forward(params, x_word, x_pos, x_pid, target))

    # sanity check vs pure-JAX reference
    e_word = jnp.take(params["embed_word"], x_word, axis=0)
    e_pos = jnp.take(params["embed_pos"], x_pos, axis=0)
    e_pid = jnp.take(params["embed_pid"], x_pid, axis=0)
    embeds = jnp.transpose(
        jnp.concatenate([e_word, e_pos, e_pid], axis=-1), (1, 0, 2))
    ref = _reference_yhat(params, embeds.astype(jnp.float32))
    assert yhat.shape == (B, Y) and loss.shape == ()
    assert jnp.allclose(yhat, ref, atol=2e-3, rtol=2e-3)

    print("KERNEL_OK")
</pallas_src>

<mosaic_0001>
module attributes {stable_mosaic.version = 11 : i64} {
  func.func @lstm_final_kernel(%arg0: i32, %arg1: memref<8x8x72xbf16, #tpu.memory_space<vmem>>, %arg2: memref<72x128xbf16, #tpu.memory_space<vmem>>, %arg3: memref<32x128xbf16, #tpu.memory_space<vmem>>, %arg4: memref<1x128xf32, #tpu.memory_space<vmem>>, %arg5: memref<32x16xbf16, #tpu.memory_space<vmem>>, %arg6: memref<1x16xf32, #tpu.memory_space<vmem>>, %arg7: memref<8x16xf32, #tpu.memory_space<vmem>>, %arg8: memref<8x8x128xf32, #tpu.memory_space<vmem>>) attributes {dimension_semantics = [#tpu.dimension_semantics<parallel>], iteration_bounds = array<i64: 1>, scalar_prefetch = 0 : i64, scratch_operands = 1 : i64, tpu.core_type = #tpu.core_type<tc>, window_params = [{transform_indices = @transform_0, window_bounds = array<i64: 8, 8, 72>}, {pipeline_mode = #tpu.pipeline_mode<synchronous>, transform_indices = @transform_1, window_bounds = array<i64: 72, 128>}, {pipeline_mode = #tpu.pipeline_mode<synchronous>, transform_indices = @transform_2, window_bounds = array<i64: 32, 128>}, {pipeline_mode = #tpu.pipeline_mode<synchronous>, transform_indices = @transform_3, window_bounds = array<i64: 1, 128>}, {pipeline_mode = #tpu.pipeline_mode<synchronous>, transform_indices = @transform_4, window_bounds = array<i64: 32, 16>}, {pipeline_mode = #tpu.pipeline_mode<synchronous>, transform_indices = @transform_5, window_bounds = array<i64: 1, 16>}, {transform_indices = @transform_6, window_bounds = array<i64: 8, 16>}]} {
    %c0 = arith.constant 0 : index
    %c0_0 = arith.constant 0 : index
    %c0_1 = arith.constant 0 : index
    %0 = vector.load %arg1[%c0, %c0_0, %c0_1] : memref<8x8x72xbf16, #tpu.memory_space<vmem>>, vector<8x8x72xbf16>
    %1 = vector.shape_cast %0 : vector<8x8x72xbf16> to vector<64x72xbf16>
    %c0_2 = arith.constant 0 : index
    %c0_3 = arith.constant 0 : index
    %2 = vector.load %arg2[%c0_2, %c0_3] : memref<72x128xbf16, #tpu.memory_space<vmem>>, vector<72x128xbf16>
    %cst = arith.constant dense<0.000000e+00> : vector<64x128xf32>
    %3 = tpu.matmul %1, %2, %cst {dimension_numbers = #tpu.dot_dimension_numbers<[1], [0], [0], [1], [0, 0, 1, 1], [], []>} : vector<64x72xbf16>, vector<72x128xbf16>, vector<64x128xf32> -> vector<64x128xf32>
    %c0_4 = arith.constant 0 : index
    %c0_5 = arith.constant 0 : index
    %4 = vector.load %arg4[%c0_4, %c0_5] : memref<1x128xf32, #tpu.memory_space<vmem>>, vector<1x128xf32>
    %5 = vector.broadcast %4 : vector<1x128xf32> to vector<64x128xf32>
    %6 = arith.addf %3, %5 : vector<64x128xf32>
    %7 = vector.shape_cast %6 : vector<64x128xf32> to vector<8x8x128xf32>
    %c0_6 = arith.constant 0 : index
    %c0_7 = arith.constant 0 : index
    %c0_8 = arith.constant 0 : index
    %8 = vector.load %arg8[%c0_6, %c0_7, %c0_8] : memref<8x8x128xf32, #tpu.memory_space<vmem>>, vector<8x8x128xf32>
    tpu.vector_store %arg8[%c0_6, %c0_7, %c0_8], %7 {strides = array<i32>} : memref<8x8x128xf32, #tpu.memory_space<vmem>>, vector<8x8x128xf32>,
    %c0_9 = arith.constant 0 : index
    %c0_10 = arith.constant 0 : index
    %9 = vector.load %arg3[%c0_9, %c0_10] : memref<32x128xbf16, #tpu.memory_space<vmem>>, vector<32x128xbf16>
    %cst_11 = arith.constant 0.000000e+00 : f32
    %10 = vector.broadcast %cst_11 : f32 to vector<8x32xf32>
    %cst_12 = arith.constant 0.000000e+00 : f32
    %11 = vector.broadcast %cst_12 : f32 to vector<8x32xf32>
    %c0_i32 = arith.constant 0 : i32
    %12 = arith.index_cast %c0_i32 : i32 to index
    %c0_13 = arith.constant 0 : index
    %c0_14 = arith.constant 0 : index
    %13 = vector.load %arg8[%12, %c0_13, %c0_14] : memref<8x8x128xf32, #tpu.memory_space<vmem>>, vector<1x8x128xf32>
    %14 = vector.shape_cast %13 : vector<1x8x128xf32> to vector<8x128xf32>
    %15 = arith.truncf %10 : vector<8x32xf32> to vector<8x32xbf16>
    %cst_15 = arith.constant dense<0.000000e+00> : vector<8x128xf32>
    %16 = tpu.matmul %15, %9, %cst_15 {dimension_numbers = #tpu.dot_dimension_numbers<[1], [0], [0], [1], [0, 0, 1, 1], [], []>} : vector<8x32xbf16>, vector<32x128xbf16>, vector<8x128xf32> -> vector<8x128xf32>
    %17 = arith.addf %14, %16 : vector<8x128xf32>
    %18 = arith.negf %17 : vector<8x128xf32>
    %19 = math.exp %18 : vector<8x128xf32>
    %cst_16 = arith.constant 1.000000e+00 : f32
    %20 = vector.broadcast %cst_16 : f32 to vector<8x128xf32>
    %21 = arith.addf %20, %19 : vector<8x128xf32>
    %22 = arith.divf %20, %21 : vector<8x128xf32>
    %23 = vector.extract_strided_slice %22 {offsets = [0, 0], sizes = [8, 32], strides = [1, 1]} : vector<8x128xf32> to vector<8x32xf32>
    %24 = vector.extract_strided_slice %22 {offsets = [0, 32], sizes = [8, 32], strides = [1, 1]} : vector<8x128xf32> to vector<8x32xf32>
    %25 = vector.extract_strided_slice %22 {offsets = [0, 96], sizes = [8, 32], strides = [1, 1]} : vector<8x128xf32> to vector<8x32xf32>
    %26 = vector.extract_strided_slice %17 {offsets = [0, 64], sizes = [8, 32], strides = [1, 1]} : vector<8x128xf32> to vector<8x32xf32>
    %27 = math.tanh %26 : vector<8x32xf32>
    %28 = arith.mulf %24, %11 : vector<8x32xf32>
    %29 = arith.mulf %23, %27 : vector<8x32xf32>
    %30 = arith.addf %28, %29 : vector<8x32xf32>
    %31 = math.tanh %30 : vector<8x32xf32>
    %32 = arith.mulf %25, %31 : vector<8x32xf32>
    %c1_i32 = arith.constant 1 : i32
    %33 = arith.index_cast %c1_i32 : i32 to index
    %c0_17 = arith.constant 0 : index
    %c0_18 = arith.constant 0 : index
    %34 = vector.load %arg8[%33, %c0_17, %c0_18] : memref<8x8x128xf32, #tpu.memory_space<vmem>>, vector<1x8x128xf32>
    %35 = vector.shape_cast %34 : vector<1x8x128xf32> to vector<8x128xf32>
    %36 = arith.truncf %32 : vector<8x32xf32> to vector<8x32xbf16>
    %cst_19 = arith.constant dense<0.000000e+00> : vector<8x128xf32>
    %37 = tpu.matmul %36, %9, %cst_19 {dimension_numbers = #tpu.dot_dimension_numbers<[1], [0], [0], [1], [0, 0, 1, 1], [], []>} : vector<8x32xbf16>, vector<32x128xbf16>, vector<8x128xf32> -> vector<8x128xf32>
    %38 = arith.addf %35, %37 : vector<8x128xf32>
    %39 = arith.negf %38 : vector<8x128xf32>
    %40 = math.exp %39 : vector<8x128xf32>
    %cst_20 = arith.constant 1.000000e+00 : f32
    %41 = vector.broadcast %cst_20 : f32 to vector<8x128xf32>
    %42 = arith.addf %41, %40 : vector<8x128xf32>
    %43 = arith.divf %41, %42 : vector<8x128xf32>
    %44 = vector.extract_strided_slice %43 {offsets = [0, 0], sizes = [8, 32], strides = [1, 1]} : vector<8x128xf32> to vector<8x32xf32>
    %45 = vector.extract_strided_slice %43 {offsets = [0, 32], sizes = [8, 32], strides = [1, 1]} : vector<8x128xf32> to vector<8x32xf32>
    %46 = vector.extract_strided_slice %43 {offsets = [0, 96], sizes = [8, 32], strides = [1, 1]} : vector<8x128xf32> to vector<8x32xf32>
    %47 = vector.extract_strided_slice %38 {offsets = [0, 64], sizes = [8, 32], strides = [1, 1]} : vector<8x128xf32> to vector<8x32xf32>
    %48 = math.tanh %47 : vector<8x32xf32>
    %49 = arith.mulf %45, %30 : vector<8x32xf32>
    %50 = arith.mulf %44, %48 : vector<8x32xf32>
    %51 = arith.addf %49, %50 : vector<8x32xf32>
    %52 = math.tanh %51 : vector<8x32xf32>
    %53 = arith.mulf %46, %52 : vector<8x32xf32>
    %c2_i32 = arith.constant 2 : i32
    %54 = arith.index_cast %c2_i32 : i32 to index
    %c0_21 = arith.constant 0 : index
    %c0_22 = arith.constant 0 : index
    %55 = vector.load %arg8[%54, %c0_21, %c0_22] : memref<8x8x128xf32, #tpu.memory_space<vmem>>, vector<1x8x128xf32>
    %56 = vector.shape_cast %55 : vector<1x8x128xf32> to vector<8x128xf32>
    %57 = arith.truncf %53 : vector<8x32xf32> to vector<8x32xbf16>
    %cst_23 = arith.constant dense<0.000000e+00> : vector<8x128xf32>
    %58 = tpu.matmul %57, %9, %cst_23 {dimension_numbers = #tpu.dot_dimension_numbers<[1], [0], [0], [1], [0, 0, 1, 1], [], []>} : vector<8x32xbf16>, vector<32x128xbf16>, vector<8x128xf32> -> vector<8x128xf32>
    %59 = arith.addf %56, %58 : vector<8x128xf32>
    %60 = arith.negf %59 : vector<8x128xf32>
    %61 = math.exp %60 : vector<8x128xf32>
    %cst_24 = arith.constant 1.000000e+00 : f32
    %62 = vector.broadcast %cst_24 : f32 to vector<8x128xf32>
    %63 = arith.addf %62, %61 : vector<8x128xf32>
    %64 = arith.divf %62, %63 : vector<8x128xf32>
    %65 = vector.extract_strided_slice %64 {offsets = [0, 0], sizes = [8, 32], strides = [1, 1]} : vector<8x128xf32> to vector<8x32xf32>
    %66 = vector.extract_strided_slice %64 {offsets = [0, 32], sizes = [8, 32], strides = [1, 1]} : vector<8x128xf32> to vector<8x32xf32>
    %67 = vector.extract_strided_slice %64 {offsets = [0, 96], sizes = [8, 32], strides = [1, 1]} : vector<8x128xf32> to vector<8x32xf32>
    %68 = vector.extract_strided_slice %59 {offsets = [0, 64], sizes = [8, 32], strides = [1, 1]} : vector<8x128xf32> to vector<8x32xf32>
    %69 = math.tanh %68 : vector<8x32xf32>
    %70 = arith.mulf %66, %51 : vector<8x32xf32>
    %71 = arith.mulf %65, %69 : vector<8x32xf32>
    %72 = arith.addf %70, %71 : vector<8x32xf32>
    %73 = math.tanh %72 : vector<8x32xf32>
    %74 = arith.mulf %67, %73 : vector<8x32xf32>
    %c3_i32 = arith.constant 3 : i32
    %75 = arith.index_cast %c3_i32 : i32 to index
    %c0_25 = arith.constant 0 : index
    %c0_26 = arith.constant 0 : index
    %76 = vector.load %arg8[%75, %c0_25, %c0_26] : memref<8x8x128xf32, #tpu.memory_space<vmem>>, vector<1x8x128xf32>
    %77 = vector.shape_cast %76 : vector<1x8x128xf32> to vector<8x128xf32>
    %78 = arith.truncf %74 : vector<8x32xf32> to vector<8x32xbf16>
    %cst_27 = arith.constant dense<0.000000e+00> : vector<8x128xf32>
    %79 = tpu.matmul %78, %9, %cst_27 {dimension_numbers = #tpu.dot_dimension_numbers<[1], [0], [0], [1], [0, 0, 1, 1], [], []>} : vector<8x32xbf16>, vector<32x128xbf16>, vector<8x128xf32> -> vector<8x128xf32>
    %80 = arith.addf %77, %79 : vector<8x128xf32>
    %81 = arith.negf %80 : vector<8x128xf32>
    %82 = math.exp %81 : vector<8x128xf32>
    %cst_28 = arith.constant 1.000000e+00 : f32
    %83 = vector.broadcast %cst_28 : f32 to vector<8x128xf32>
    %84 = arith.addf %83, %82 : vector<8x128xf32>
    %85 = arith.divf %83, %84 : vector<8x128xf32>
    %86 = vector.extract_strided_slice %85 {offsets = [0, 0], sizes = [8, 32], strides = [1, 1]} : vector<8x128xf32> to vector<8x32xf32>
    %87 = vector.extract_strided_slice %85 {offsets = [0, 32], sizes = [8, 32], strides = [1, 1]} : vector<8x128xf32> to vector<8x32xf32>
    %88 = vector.extract_strided_slice %85 {offsets = [0, 96], sizes = [8, 32], strides = [1, 1]} : vector<8x128xf32> to vector<8x32xf32>
    %89 = vector.extract_strided_slice %80 {offsets = [0, 64], sizes = [8, 32], strides = [1, 1]} : vector<8x128xf32> to vector<8x32xf32>
    %90 = math.tanh %89 : vector<8x32xf32>
    %91 = arith.mulf %87, %72 : vector<8x32xf32>
    %92 = arith.mulf %86, %90 : vector<8x32xf32>
    %93 = arith.addf %91, %92 : vector<8x32xf32>
    %94 = math.tanh %93 : vector<8x32xf32>
    %95 = arith.mulf %88, %94 : vector<8x32xf32>
    %c4_i32 = arith.constant 4 : i32
    %96 = arith.index_cast %c4_i32 : i32 to index
    %c0_29 = arith.constant 0 : index
    %c0_30 = arith.constant 0 : index
    %97 = vector.load %arg8[%96, %c0_29, %c0_30] : memref<8x8x128xf32, #tpu.memory_space<vmem>>, vector<1x8x128xf32>
    %98 = vector.shape_cast %97 : vector<1x8x128xf32> to vector<8x128xf32>
    %99 = arith.truncf %95 : vector<8x32xf32> to vector<8x32xbf16>
    %cst_31 = arith.constant dense<0.000000e+00> : vector<8x128xf32>
    %100 = tpu.matmul %99, %9, %cst_31 {dimension_numbers = #tpu.dot_dimension_numbers<[1], [0], [0], [1], [0, 0, 1, 1], [], []>} : vector<8x32xbf16>, vector<32x128xbf16>, vector<8x128xf32> -> vector<8x128xf32>
    %101 = arith.addf %98, %100 : vector<8x128xf32>
    %102 = arith.negf %101 : vector<8x128xf32>
    %103 = math.exp %102 : vector<8x128xf32>
    %cst_32 = arith.constant 1.000000e+00 : f32
    %104 = vector.broadcast %cst_32 : f32 to vector<8x128xf32>
    %105 = arith.addf %104, %103 : vector<8x128xf32>
    %106 = arith.divf %104, %105 : vector<8x128xf32>
    %107 = vector.extract_strided_slice %106 {offsets = [0, 0], sizes = [8, 32], strides = [1, 1]} : vector<8x128xf32> to vector<8x32xf32>
    %108 = vector.extract_strided_slice %106 {offsets = [0, 32], sizes = [8, 32], strides = [1, 1]} : vector<8x128xf32> to vector<8x32xf32>
    %109 = vector.extract_strided_slice %106 {offsets = [0, 96], sizes = [8, 32], strides = [1, 1]} : vector<8x128xf32> to vector<8x32xf32>
    %110 = vector.extract_strided_slice %101 {offsets = [0, 64], sizes = [8, 32], strides = [1, 1]} : vector<8x128xf32> to vector<8x32xf32>
    %111 = math.tanh %110 : vector<8x32xf32>
    %112 = arith.mulf %108, %93 : vector<8x32xf32>
    %113 = arith.mulf %107, %111 : vector<8x32xf32>
    %114 = arith.addf %112, %113 : vector<8x32xf32>
    %115 = math.tanh %114 : vector<8x32xf32>
    %116 = arith.mulf %109, %115 : vector<8x32xf32>
    %c5_i32 = arith.constant 5 : i32
    %117 = arith.index_cast %c5_i32 : i32 to index
    %c0_33 = arith.constant 0 : index
    %c0_34 = arith.constant 0 : index
    %118 = vector.load %arg8[%117, %c0_33, %c0_34] : memref<8x8x128xf32, #tpu.memory_space<vmem>>, vector<1x8x128xf32>
    %119 = vector.shape_cast %118 : vector<1x8x128xf32> to vector<8x128xf32>
    %120 = arith.truncf %116 : vector<8x32xf32> to vector<8x32xbf16>
    %cst_35 = arith.constant dense<0.000000e+00> : vector<8x128xf32>
    %121 = tpu.matmul %120, %9, %cst_35 {dimension_numbers = #tpu.dot_dimension_numbers<[1], [0], [0], [1], [0, 0, 1, 1], [], []>} : vector<8x32xbf16>, vector<32x128xbf16>, vector<8x128xf32> -> vector<8x128xf32>
    %122 = arith.addf %119, %121 : vector<8x128xf32>
    %123 = arith.negf %122 : vector<8x128xf32>
    %124 = math.exp %123 : vector<8x128xf32>
    %cst_36 = arith.constant 1.000000e+00 : f32
    %125 = vector.broadcast %cst_36 : f32 to vector<8x128xf32>
    %126 = arith.addf %125, %124 : vector<8x128xf32>
    %127 = arith.divf %125, %126 : vector<8x128xf32>
    %128 = vector.extract_strided_slice %127 {offsets = [0, 0], sizes = [8, 32], strides = [1, 1]} : vector<8x128xf32> to vector<8x32xf32>
    %129 = vector.extract_strided_slice %127 {offsets = [0, 32], sizes = [8, 32], strides = [1, 1]} : vector<8x128xf32> to vector<8x32xf32>
    %130 = vector.extract_strided_slice %127 {offsets = [0, 96], sizes = [8, 32], strides = [1, 1]} : vector<8x128xf32> to vector<8x32xf32>
    %131 = vector.extract_strided_slice %122 {offsets = [0, 64], sizes = [8, 32], strides = [1, 1]} : vector<8x128xf32> to vector<8x32xf32>
    %132 = math.tanh %131 : vector<8x32xf32>
    %133 = arith.mulf %129, %114 : vector<8x32xf32>
    %134 = arith.mulf %128, %132 : vector<8x32xf32>
    %135 = arith.addf %133, %134 : vector<8x32xf32>
    %136 = math.tanh %135 : vector<8x32xf32>
    %137 = arith.mulf %130, %136 : vector<8x32xf32>
    %c6_i32 = arith.constant 6 : i32
    %138 = arith.index_cast %c6_i32 : i32 to index
    %c0_37 = arith.constant 0 : index
    %c0_38 = arith.constant 0 : index
    %139 = vector.load %arg8[%138, %c0_37, %c0_38] : memref<8x8x128xf32, #tpu.memory_space<vmem>>, vector<1x8x128xf32>
    %140 = vector.shape_cast %139 : vector<1x8x128xf32> to vector<8x128xf32>
    %141 = arith.truncf %137 : vector<8x32xf32> to vector<8x32xbf16>
    %cst_39 = arith.constant dense<0.000000e+00> : vector<8x128xf32>
    %142 = tpu.matmul %141, %9, %cst_39 {dimension_numbers = #tpu.dot_dimension_numbers<[1], [0], [0], [1], [0, 0, 1, 1], [], []>} : vector<8x32xbf16>, vector<32x128xbf16>, vector<8x128xf32> -> vector<8x128xf32>
    %143 = arith.addf %140, %142 : vector<8x128xf32>
    %144 = arith.negf %143 : vector<8x128xf32>
    %145 = math.exp %144 : vector<8x128xf32>
    %cst_40 = arith.constant 1.000000e+00 : f32
    %146 = vector.broadcast %cst_40 : f32 to vector<8x128xf32>
    %147 = arith.addf %146, %145 : vector<8x128xf32>
    %148 = arith.divf %146, %147 : vector<8x128xf32>
    %149 = vector.extract_strided_slice %148 {offsets = [0, 0], sizes = [8, 32], strides = [1, 1]} : vector<8x128xf32> to vector<8x32xf32>
    %150 = vector.extract_strided_slice %148 {offsets = [0, 32], sizes = [8, 32], strides = [1, 1]} : vector<8x128xf32> to vector<8x32xf32>
    %151 = vector.extract_strided_slice %148 {offsets = [0, 96], sizes = [8, 32], strides = [1, 1]} : vector<8x128xf32> to vector<8x32xf32>
    %152 = vector.extract_strided_slice %143 {offsets = [0, 64], sizes = [8, 32], strides = [1, 1]} : vector<8x128xf32> to vector<8x32xf32>
    %153 = math.tanh %152 : vector<8x32xf32>
    %154 = arith.mulf %150, %135 : vector<8x32xf32>
    %155 = arith.mulf %149, %153 : vector<8x32xf32>
    %156 = arith.addf %154, %155 : vector<8x32xf32>
    %157 = math.tanh %156 : vector<8x32xf32>
    %158 = arith.mulf %151, %157 : vector<8x32xf32>
    %c7_i32 = arith.constant 7 : i32
    %159 = arith.index_cast %c7_i32 : i32 to index
    %c0_41 = arith.constant 0 : index
    %c0_42 = arith.constant 0 : index
    %160 = vector.load %arg8[%159, %c0_41, %c0_42] : memref<8x8x128xf32, #tpu.memory_space<vmem>>, vector<1x8x128xf32>
    %161 = vector.shape_cast %160 : vector<1x8x128xf32> to vector<8x128xf32>
    %162 = arith.truncf %158 : vector<8x32xf32> to vector<8x32xbf16>
    %cst_43 = arith.constant dense<0.000000e+00> : vector<8x128xf32>
    %163 = tpu.matmul %162, %9, %cst_43 {dimension_numbers = #tpu.dot_dimension_numbers<[1], [0], [0], [1], [0, 0, 1, 1], [], []>} : vector<8x32xbf16>, vector<32x128xbf16>, vector<8x128xf32> -> vector<8x128xf32>
    %164 = arith.addf %161, %163 : vector<8x128xf32>
    %165 = arith.negf %164 : vector<8x128xf32>
    %166 = math.exp %165 : vector<8x128xf32>
    %cst_44 = arith.constant 1.000000e+00 : f32
    %167 = vector.broadcast %cst_44 : f32 to vector<8x128xf32>
    %168 = arith.addf %167, %166 : vector<8x128xf32>
    %169 = arith.divf %167, %168 : vector<8x128xf32>
    %170 = vector.extract_strided_slice %169 {offsets = [0, 0], sizes = [8, 32], strides = [1, 1]} : vector<8x128xf32> to vector<8x32xf32>
    %171 = vector.extract_strided_slice %169 {offsets = [0, 32], sizes = [8, 32], strides = [1, 1]} : vector<8x128xf32> to vector<8x32xf32>
    %172 = vector.extract_strided_slice %169 {offsets = [0, 96], sizes = [8, 32], strides = [1, 1]} : vector<8x128xf32> to vector<8x32xf32>
    %173 = vector.extract_strided_slice %164 {offsets = [0, 64], sizes = [8, 32], strides = [1, 1]} : vector<8x128xf32> to vector<8x32xf32>
    %174 = math.tanh %173 : vector<8x32xf32>
    %175 = arith.mulf %171, %156 : vector<8x32xf32>
    %176 = arith.mulf %170, %174 : vector<8x32xf32>
    %177 = arith.addf %175, %176 : vector<8x32xf32>
    %178 = math.tanh %177 : vector<8x32xf32>
    %179 = arith.mulf %172, %178 : vector<8x32xf32>
    %c8_i32 = arith.constant 8 : i32
    %180 = arith.truncf %179 : vector<8x32xf32> to vector<8x32xbf16>
    %c0_45 = arith.constant 0 : index
    %c0_46 = arith.constant 0 : index
    %181 = vector.load %arg5[%c0_45, %c0_46] : memref<32x16xbf16, #tpu.memory_space<vmem>>, vector<32x16xbf16>
    %cst_47 = arith.constant dense<0.000000e+00> : vector<8x16xf32>
    %182 = tpu.matmul %180, %181, %cst_47 {dimension_numbers = #tpu.dot_dimension_numbers<[1], [0], [0], [1], [0, 0, 1, 1], [], []>} : vector<8x32xbf16>, vector<32x16xbf16>, vector<8x16xf32> -> vector<8x16xf32>
    %c0_48 = arith.constant 0 : index
    %c0_49 = arith.constant 0 : index
    %183 = vector.load %arg6[%c0_48, %c0_49] : memref<1x16xf32, #tpu.memory_space<vmem>>, vector<1x16xf32>
    %184 = vector.broadcast %183 : vector<1x16xf32> to vector<8x16xf32>
    %185 = arith.addf %182, %184 : vector<8x16xf32>
    %186 = arith.negf %185 : vector<8x16xf32>
    %187 = math.exp %186 : vector<8x16xf32>
    %cst_50 = arith.constant 1.000000e+00 : f32
    %188 = vector.broadcast %cst_50 : f32 to vector<8x16xf32>
    %189 = arith.addf %188, %187 : vector<8x16xf32>
    %190 = arith.divf %188, %189 : vector<8x16xf32>
    %c0_51 = arith.constant 0 : index
    %c0_52 = arith.constant 0 : index
    %191 = vector.load %arg7[%c0_51, %c0_52] : memref<8x16xf32, #tpu.memory_space<vmem>>, vector<8x16xf32>
    tpu.vector_store %arg7[%c0_51, %c0_52], %190 {strides = array<i32>} : memref<8x16xf32, #tpu.memory_space<vmem>>, vector<8x16xf32>,
    return
  }
  func.func @transform_0(%arg0: i32) -> (i32, i32, i32) {
    %c0_i32 = arith.constant 0 : i32
    %c0_i32_0 = arith.constant 0 : i32
    %c0_i32_1 = arith.constant 0 : i32
    return %c0_i32, %arg0, %c0_i32_0 : i32, i32, i32
  }
  func.func @transform_1(%arg0: i32) -> (i32, i32) {
    %c0_i32 = arith.constant 0 : i32
    %c0_i32_0 = arith.constant 0 : i32
    %c0_i32_1 = arith.constant 0 : i32
    return %c0_i32, %c0_i32_0 : i32, i32
  }
  func.func @transform_2(%arg0: i32) -> (i32, i32) {
    %c0_i32 = arith.constant 0 : i32
    %c0_i32_0 = arith.constant 0 : i32
    %c0_i32_1 = arith.constant 0 : i32
    return %c0_i32, %c0_i32_0 : i32, i32
  }
  func.func @transform_3(%arg0: i32) -> (i32, i32) {
    %c0_i32 = arith.constant 0 : i32
    %c0_i32_0 = arith.constant 0 : i32
    %c0_i32_1 = arith.constant 0 : i32
    return %c0_i32, %c0_i32_0 : i32, i32
  }
  func.func @transform_4(%arg0: i32) -> (i32, i32) {
    %c0_i32 = arith.constant 0 : i32
    %c0_i32_0 = arith.constant 0 : i32
    %c0_i32_1 = arith.constant 0 : i32
    return %c0_i32, %c0_i32_0 : i32, i32
  }
  func.func @transform_5(%arg0: i32) -> (i32, i32) {
    %c0_i32 = arith.constant 0 : i32
    %c0_i32_0 = arith.constant 0 : i32
    %c0_i32_1 = arith.constant 0 : i32
    return %c0_i32, %c0_i32_0 : i32, i32
  }
  func.func @transform_6(%arg0: i32) -> (i32, i32) {
    %c0_i32 = arith.constant 0 : i32
    %c0_i32_0 = arith.constant 0 : i32
    return %arg0, %c0_i32 : i32, i32
  }
}

</mosaic_0001>

<bundles_post_ra>
// kernel: tpu_custom_call.1
= control target key start
LH: loop header
LB: loop body
LE: loop exit
PB: predicated region body
PF: predicated region fallthrough
CT: control target
= control target key end

     0   :  { %11 = vsyncpa [#allocation4], 0  ;;  %s1428_s0 = inlined_call_operand.hbm [shape: bf16[8,8,72], index: 0, kind: input, shape index: {}]   ;;  %s1429_s1 = inlined_call_operand.hbm [shape: bf16[72,128], index: 1, kind: input, shape index: {}]   ;;  %s1430_s2 = inlined_call_operand.vmem [shape: bf16[32,128], index: 2, kind: input, shape index: {}]   ;;  %s1431_s3 = inlined_call_operand.vmem [shape: f32[1,128], index: 3, kind: input, shape index: {}]   ;;  %s1432_s4 = inlined_call_operand.vmem [shape: bf16[32,16], index: 4, kind: input, shape index: {}]   ;;  %s1433_s5 = inlined_call_operand.vmem [shape: f32[1,16], index: 5, kind: input, shape index: {}]   ;;  %s1434_s6 = inlined_call_operand.hbm [shape: f32[8,16], index: 6, kind: output, shape index: {}]  }
   0x1   :  { %12 = vsyncpa [#allocation7], 0 }
   0x2   :  { %13 = vsyncpa [#allocation5], 0  ;;  %s1231_s21 = smov [#allocation3]  }
   0x3   :  { %s19_s22 = sshll.u32 %s1231_s21, 4  ;;  %s20_s22 = int_to_ptr.vmem [resolvable:$true] %s19_s22 }
   0x4   :  { %s1173_s23 = scalar_lea.vmem %s20_s22, 512  ;;  %p1178_p1 = scmp.lt.s32.totalorder %s20_s22, %s20_s22 }
   0x5   :  { %p1174_p0 = scmp.ne.s32.totalorder %s20_s22, %s1173_s23  ;;  %p1179_p2 = scmp.lt.s32.totalorder %s1173_s23, %s1173_s23 }
   0x7   :  { %p1180_p3 = por %p1179_p2, %p1178_p1 }
   0x9   :  { %p1181_p4 = pnand %p1180_p3, %p1174_p0 }
   0xb   :  { %1184 = shalt.err (!%p1181_p4)
}
   0xc   :  { %s1232_s24 = smov 64   ;;  %s1233_s25 = smov 4  }
   0xd   :  { %25 = dma.hbm_to_vmem [thread:$0]  %s1428_s0, 512, %s20_s22, [#allocation4], %s1232_s24, %s1232_s24, %s1233_s25  }
   0xe   :  { %s1234_s28 = smov [#allocation6]  }
   0xf   :  { %s31_s29 = sshll.u32 %s1234_s28, 4  ;;  %s32_s29 = int_to_ptr.vmem [resolvable:$true] %s31_s29 }
  0x10   :  { %s1193_s30 = scalar_lea.vmem %s32_s29, 576  ;;  %p1198_p6 = scmp.lt.s32.totalorder %s32_s29, %s32_s29 }
  0x11   :  { %p1194_p5 = scmp.ne.s32.totalorder %s32_s29, %s1193_s30  ;;  %p1199_p7 = scmp.lt.s32.totalorder %s1193_s30, %s1193_s30 }
  0x13   :  { %p1200_p8 = por %p1199_p7, %p1198_p6 }
  0x15   :  { %p1201_p9 = pnand %p1200_p8, %p1194_p5 }
  0x17   :  { %1204 = shalt.err (!%p1201_p9)
}
  0x18   :  { %37 = dma.hbm_to_vmem [thread:$0]  %s1429_s1, 576, %s32_s29, [#allocation7], %s1232_s24, %s1232_s24, %s1233_s25  }
  0x19   :  { %1225 = dma.done.wait [#allocation4], 512  }
  0x1a   :  { %1226 = vsyncadd [#allocation4], 4294966784 }
  0x1b   :  { %1227 = dma.done.wait [#allocation7], 576  }
  0x1c   :  { %1228 = vsyncadd [#allocation7], 4294966720  ;;  %v1235_v0 = vmov 0.0   ;;  %vm1236_vm0 = vmmov 0   ;;  %vm137_vm1 = vcmask 1043456   ;;  %v1085_v2 = vld [vmem:[#allocation6 + $0x18] sm:$0xff]  }
  0x1d   :  { %1002 = vmatprep.subr.bf16.mxu1 %v1235_v0  ;;  %1006 = vmatprep.mubr.msk.bf16.mxu1 %vm1236_vm0, %v1235_v0  ;;  %v1084_v1 = vld [vmem:[#allocation6 + $0x20] ss:$0 sps:$4 sm:$0xff]   ;;  %v1291_v4 = vld [vmem:[%s1430_s2 + $0x8] sm:$0xff]   ;;  %v1086_v5 = vld [vmem:[#allocation6 + $0x10] sm:$0xff]   ;;  %vm124_vm2 = vcmask 588800   ;;  %v1237_v10 = vmov 0  }
  0x1e   :  { %1074 = vmatprep.subr.msk.bf16.mxu0 %vm137_vm1, %v1084_v1  ;;  %v139_v3 = vsel %vm137_vm1, %v1084_v1, 0  ;;  %1003 = vmatpush3.bf16.msra.mxu1 %v1291_v4  ;;  %v1297_v6 = vld [vmem:[%s1430_s2] sm:$0xff]   ;;  %v1088_v8 = vld [vmem:[#allocation6 + $0x8] sm:$0xff]   ;;  %s1238_s12 = smov 32   ;;  %vm231_vm3 = vcmask 261120   ;;  %vm894_vm4 = vcmask 130048  }
  0x1f   :  { %985 = vmatpush3.bf16.msra.mxu0 %v139_v3  ;;  %1004 = vmatprep.subr.bf16.mxu1 %v1235_v0  ;;  %v1091_v7 = vld [vmem:[#allocation3] sm:$0xff]   ;;  %v1092_v11 = vld [vmem:[#allocation3 + $0x8] sm:$0xff]  }
  0x20   :  { %986 = vmatprep.subr.bf16.mxu0 %v1085_v2  ;;  %994 = vmatprep.mubr.msk.bf16.mxu0 %vm124_vm2, %v1091_v7  ;;  %v1090_v9 = vld [vmem:[#allocation6] sm:$0xff]  }
  0x21   :  { %v1320_v17 = vld [vmem:[%s1431_s3] ss:$0 sm:$0xff] }
  0x22   :  { %1005 = vmatpush3.bf16.msra.mxu1 %v1297_v6 }
  0x23   :  { %987 = vmatpush3.bf16.msra.mxu0 %v1085_v2  ;;  %1010 = vmatprep.subr.bf16.mxu1 %v1235_v0 }
  0x24   :  { %988 = vmatprep.subr.bf16.mxu0 %v1086_v5 }
  0x25   :  { %1007 = vmatmul.mubr.bf16.vlgmr.msra.gmra.mxu1 %v1237_v10 }
  0x26   :  { %1011 = vmatpush3.bf16.msra.mxu1 %v1291_v4  ;;  %1014 = vmatprep.mubr.msk.bf16.mxu1 %vm1236_vm0, %v1235_v0 }
  0x27   :  { %989 = vmatpush3.bf16.msra.mxu0 %v1086_v5  ;;  %1012 = vmatprep.subr.bf16.mxu1 %v1235_v0 }
  0x28   :  { %990 = vmatprep.subr.bf16.mxu0 %v1088_v8 }
  0x2a   :  { %1013 = vmatpush3.bf16.msra.mxu1 %v1297_v6 }
  0x2b   :  { %991 = vmatpush3.bf16.msra.mxu0 %v1088_v8  ;;  %1018 = vmatprep.subr.bf16.mxu1 %v1235_v0 }
  0x2c   :  { %992 = vmatprep.subr.bf16.mxu0 %v1090_v9 }
  0x2f   :  { %993 = vmatpush3.bf16.msra.mxu0 %v1090_v9 }
  0x30   :  { %1034 = vmatprep.subr.bf16.mxu0 %v1235_v0 }
  0x32   :  { %995 = vmatmul.mubr.msk.bf16.vlgmr.msra.gmra.mxu0 %vm124_vm2, %v1092_v11 }
  0x33   :  { %1035 = vmatpush3.bf16.msra.mxu0 %v1291_v4 }
  0x34   :  { %1036 = vmatprep.subr.bf16.mxu0 %v1235_v0 }
  0x37   :  { %1037 = vmatpush3.bf16.msra.mxu0 %v1297_v6 }
  0x38   :  { %1050 = vmatprep.subr.bf16.mxu0 %v1235_v0 }
  0xe5   :  { %v269_v12 = vpop.f32.mrf.mxu1 }
  0xe7   :  { %v1008_v13 = vpop.f32.mrf.mxu1 }
  0xe9   :  { %v272_v14 = vpop.f32.mrf.mxu1 }
  0xeb   :  { %v1009_v15 = vpop.f32.mrf.mxu1 }
  0xf2   :  { %v1315_v16 = vpop.f32.mrf.mxu0 }
  0xf3   :  { %v184_v59 = vadd.f32 %v1315_v16, %v1320_v17 }
  0xf4   :  { %v175_v18 = vpop.f32.mrf.mxu0 }
  0xf5   :  { %v176_v19 = vadd.f32 %v1320_v17, %v175_v18 }
  0xf6   :  { %v1334_v36 = vpop.f32.mrf.mxu0 }
  0xf7   :  { %v275_v20 = vadd.f32 %v269_v12, %v176_v19 }
  0xf8   :  { %v178_v37 = vpop.f32.mrf.mxu0 }
  0xf9   :  { %1097 = vtanh.f32 %v275_v20  ;;  %v928_v22 = vmul.f32 -1.442695, %v275_v20  ;;  %v179_v38 = vadd.f32 %v1320_v17, %v178_v37  ;;  %v187_v20 = vadd.f32 %v1334_v36, %v1320_v17  ;;  %v1093_v36 = vld [vmem:[#allocation3 + $0x10] sm:$0xff]   ;;  %v1094_v37 = vld [vmem:[#allocation3 + $0x18] sm:$0xff]  }
  0xfa   :  { %998 = vmatprep.mubr.msk.bf16.mxu0 %vm124_vm2, %v1093_v36 }
  0xfb   :  { %1099 = vpow2.f32 %v928_v22  ;;  %999 = vmatmul.mubr.msk.bf16.gmra.mxu0 %vm124_vm2, %v1094_v37 }
  0xfc   :  { %1038 = vmatprep.mubr.msk.bf16.mxu0 %vm1236_vm0, %v1235_v0 }
 0x106   :  { %v1098_v21 = vpop.eup %1097 }
 0x107   :  { %285 = vrot.lane.b32.xlu0 %v1098_v21, %s1232_s24 }
 0x108   :  { %v1100_v23 = vpop.eup %1099 }
 0x109   :  { %v279_v24 = vadd.f32 1.0, %v1100_v23 }
 0x10b   :  { %1101 = vrcp.f32 %v279_v24 }
 0x118   :  { %v1102_v25 = vpop.eup %1101 }
 0x119   :  { %v283_v28 = vmul.f32 0.0, %v1102_v25 }
 0x179   :  { %v286_v26 = vpop.permute.xlu0 %285 }
 0x17a   :  { %v288_v27 = vmul.f32 %v1102_v25, %v286_v26 }
 0x17c   :  { %290 = vrot.lane.b32.xlu0 %v288_v27, %s1238_s12 }
 0x1ee   :  { %v291_v29 = vpop.permute.xlu0 %290 }
 0x1ef   :  { %v293_v30 = vadd.f32 %v291_v29, %v283_v28 }
 0x1f1   :  { %1103 = vtanh.f32 %v293_v30 }
 0x1fe   :  { %v1104_v31 = vpop.eup %1103 }
 0x1ff   :  { %296 = vrot.lane.b32.xlu1 %v1104_v31, %s1232_s24 }
 0x271   :  { %v297_v32 = vpop.permute.xlu1 %296 }
 0x272   :  { %v299_v33 = vmul.f32 %v1102_v25, %v297_v32 }
 0x274   :  { %v302_v34 = vpack.c.bf16 %v299_v33, %v299_v33 }
 0x276   :  { %304 = vrot.lane.b32.xlu1 %v302_v34, %s1238_s12 }
 0x2e8   :  { %v305_v35 = vpop.permute.xlu1 %304 }
 0x2e9   :  { %1015 = vmatmul.mubr.msk.bf16.vlgmr.msra.gmra.mxu1 %vm231_vm3, %v305_v35 }
 0x2ea   :  { %1019 = vmatpush3.bf16.msra.mxu1 %v1291_v4  ;;  %1022 = vmatprep.mubr.msk.bf16.mxu1 %vm1236_vm0, %v1235_v0 }
 0x2eb   :  { %1020 = vmatprep.subr.bf16.mxu1 %v1235_v0 }
 0x2ee   :  { %1021 = vmatpush3.bf16.msra.mxu1 %v1297_v6 }
 0x2ef   :  { %1026 = vmatprep.subr.bf16.mxu1 %v1235_v0 }
 0x3a9   :  { %v343_v39 = vpop.f32.mrf.mxu1 }
 0x3aa   :  { %v349_v40 = vadd.f32 %v343_v39, %v179_v38 }
 0x3ab   :  { %v1016_v41 = vpop.f32.mrf.mxu1 }
 0x3ac   :  { %1105 = vtanh.f32 %v349_v40  ;;  %v930_v45 = vmul.f32 -1.442695, %v349_v40 }
 0x3ad   :  { %v346_v42 = vpop.f32.mrf.mxu1 }
 0x3ae   :  { %1107 = vpow2.f32 %v930_v45 }
 0x3af   :  { %v1017_v43 = vpop.f32.mrf.mxu1 }
 0x3b0   :  { %v1378_v43 = vpop.f32.mrf.mxu0 }
 0x3b9   :  { %v1106_v44 = vpop.eup %1105 }
 0x3ba   :  { %359 = vrot.lane.b32.xlu0 %v1106_v44, %s1232_s24  ;;  %v191_v44 = vpop.f32.mrf.mxu0 }
 0x3bb   :  { %v1108_v46 = vpop.eup %1107 }
 0x3bc   :  { %v353_v47 = vadd.f32 1.0, %v1108_v46  ;;  %v1380_v45 = vpop.f32.mrf.mxu0 }
 0x3be   :  { %1109 = vrcp.f32 %v353_v47  ;;  %v194_v46 = vpop.f32.mrf.mxu0  ;;  %v192_v47 = vadd.f32 %v1320_v17, %v191_v44 }
 0x3cb   :  { %v1110_v48 = vpop.eup %1109 }
 0x3cc   :  { %v357_v51 = vmul.f32 %v1110_v48, %v293_v30 }
 0x42c   :  { %v360_v49 = vpop.permute.xlu0 %359 }
 0x42d   :  { %v362_v50 = vmul.f32 %v1110_v48, %v360_v49 }
 0x42f   :  { %364 = vrot.lane.b32.xlu1 %v362_v50, %s1238_s12 }
 0x4a1   :  { %v365_v52 = vpop.permute.xlu1 %364 }
 0x4a2   :  { %v367_v53 = vadd.f32 %v365_v52, %v357_v51 }
 0x4a4   :  { %1111 = vtanh.f32 %v367_v53 }
 0x4b1   :  { %v1112_v54 = vpop.eup %1111 }
 0x4b2   :  { %370 = vrot.lane.b32.xlu0 %v1112_v54, %s1232_s24 }
 0x524   :  { %v371_v55 = vpop.permute.xlu0 %370 }
 0x525   :  { %v373_v56 = vmul.f32 %v1110_v48, %v371_v55 }
 0x527   :  { %v376_v57 = vpack.c.bf16 %v373_v56, %v373_v56 }
 0x529   :  { %378 = vrot.lane.b32.xlu1 %v376_v57, %s1238_s12 }
 0x59b   :  { %v379_v58 = vpop.permute.xlu1 %378 }
 0x59c   :  { %1023 = vmatmul.mubr.msk.bf16.vlgmr.msra.gmra.mxu1 %vm231_vm3, %v379_v58 }
 0x59d   :  { %1027 = vmatpush3.bf16.msra.mxu1 %v1291_v4  ;;  %1030 = vmatprep.mubr.msk.bf16.mxu1 %vm1236_vm0, %v1235_v0 }
 0x59e   :  { %1028 = vmatprep.subr.bf16.mxu1 %v1235_v0 }
 0x5a1   :  { %1029 = vmatpush3.bf16.msra.mxu1 %v1297_v6 }
 0x5a2   :  { %1042 = vmatprep.subr.bf16.mxu1 %v1235_v0 }
 0x65c   :  { %v417_v60 = vpop.f32.mrf.mxu1 }
 0x65d   :  { %v423_v61 = vadd.f32 %v417_v60, %v184_v59 }
 0x65e   :  { %v1024_v62 = vpop.f32.mrf.mxu1 }
 0x65f   :  { %1113 = vtanh.f32 %v423_v61  ;;  %v932_v3 = vmul.f32 -1.442695, %v423_v61 }
 0x660   :  { %v420_v63 = vpop.f32.mrf.mxu1 }
 0x661   :  { %1115 = vpow2.f32 %v932_v3 }
 0x662   :  { %v1025_v1 = vpop.f32.mrf.mxu1 }
 0x66c   :  { %v1114_v2 = vpop.eup %1113 }
 0x66d   :  { %433 = vrot.lane.b32.xlu0 %v1114_v2, %s1232_s24 }
 0x66e   :  { %v1116_v5 = vpop.eup %1115 }
 0x66f   :  { %v427_v7 = vadd.f32 1.0, %v1116_v5 }
 0x671   :  { %1117 = vrcp.f32 %v427_v7  ;;  %v195_v7 = vadd.f32 %v1320_v17, %v194_v46 }
 0x67e   :  { %v1118_v8 = vpop.eup %1117 }
 0x67f   :  { %v431_v11 = vmul.f32 %v1118_v8, %v367_v53 }
 0x6df   :  { %v434_v9 = vpop.permute.xlu0 %433 }
 0x6e0   :  { %v436_v10 = vmul.f32 %v1118_v8, %v434_v9 }
 0x6e2   :  { %438 = vrot.lane.b32.xlu1 %v436_v10, %s1238_s12 }
 0x754   :  { %v439_v12 = vpop.permute.xlu1 %438 }
 0x755   :  { %v441_v13 = vadd.f32 %v439_v12, %v431_v11 }
 0x757   :  { %1119 = vtanh.f32 %v441_v13 }
 0x764   :  { %v1120_v14 = vpop.eup %1119 }
 0x765   :  { %444 = vrot.lane.b32.xlu0 %v1120_v14, %s1232_s24 }
 0x7d7   :  { %v445_v15 = vpop.permute.xlu0 %444 }
 0x7d8   :  { %v447_v16 = vmul.f32 %v1118_v8, %v445_v15 }
 0x7da   :  { %v450_v18 = vpack.c.bf16 %v447_v16, %v447_v16 }
 0x7dc   :  { %452 = vrot.lane.b32.xlu1 %v450_v18, %s1238_s12 }
 0x84e   :  { %v453_v19 = vpop.permute.xlu1 %452 }
 0x84f   :  { %1031 = vmatmul.mubr.msk.bf16.vlgmr.msra.gmra.mxu1 %vm231_vm3, %v453_v19 }
 0x850   :  { %1043 = vmatpush3.bf16.msra.mxu1 %v1291_v4  ;;  %1046 = vmatprep.mubr.msk.bf16.mxu1 %vm1236_vm0, %v1235_v0 }
 0x851   :  { %1044 = vmatprep.subr.bf16.mxu1 %v1235_v0 }
 0x854   :  { %1045 = vmatpush3.bf16.msra.mxu1 %v1297_v6 }
 0x855   :  { %1058 = vmatprep.subr.bf16.mxu1 %v1235_v0 }
 0x90f   :  { %v491_v21 = vpop.f32.mrf.mxu1 }
 0x910   :  { %v497_v22 = vadd.f32 %v491_v21, %v187_v20 }
 0x911   :  { %v1032_v23 = vpop.f32.mrf.mxu1 }
 0x912   :  { %1121 = vtanh.f32 %v497_v22  ;;  %v934_v27 = vmul.f32 -1.442695, %v497_v22 }
 0x913   :  { %v494_v24 = vpop.f32.mrf.mxu1 }
 0x914   :  { %1123 = vpow2.f32 %v934_v27  ;;  %v200_v27 = vadd.f32 %v1378_v43, %v1320_v17 }
 0x915   :  { %v1033_v25 = vpop.f32.mrf.mxu1 }
 0x91f   :  { %v1122_v26 = vpop.eup %1121 }
 0x920   :  { %507 = vrot.lane.b32.xlu0 %v1122_v26, %s1232_s24 }
 0x921   :  { %v1124_v28 = vpop.eup %1123 }
 0x922   :  { %v501_v29 = vadd.f32 1.0, %v1124_v28 }
 0x924   :  { %1125 = vrcp.f32 %v501_v29 }
 0x931   :  { %v1126_v30 = vpop.eup %1125 }
 0x932   :  { %v505_v33 = vmul.f32 %v1126_v30, %v441_v13 }
 0x992   :  { %v508_v31 = vpop.permute.xlu0 %507 }
 0x993   :  { %v510_v32 = vmul.f32 %v1126_v30, %v508_v31 }
 0x995   :  { %512 = vrot.lane.b32.xlu1 %v510_v32, %s1238_s12 }
 0xa07   :  { %v513_v34 = vpop.permute.xlu1 %512 }
 0xa08   :  { %v515_v35 = vadd.f32 %v513_v34, %v505_v33 }
 0xa0a   :  { %1127 = vtanh.f32 %v515_v35 }
 0xa17   :  { %v1128_v38 = vpop.eup %1127 }
 0xa18   :  { %518 = vrot.lane.b32.xlu0 %v1128_v38, %s1232_s24 }
 0xa8a   :  { %v519_v39 = vpop.permute.xlu0 %518 }
 0xa8b   :  { %v521_v40 = vmul.f32 %v1126_v30, %v519_v39 }
 0xa8d   :  { %v524_v41 = vpack.c.bf16 %v521_v40, %v521_v40 }
 0xa8f   :  { %526 = vrot.lane.b32.xlu1 %v524_v41, %s1238_s12 }
 0xb01   :  { %v527_v42 = vpop.permute.xlu1 %526 }
 0xb02   :  { %1039 = vmatmul.mubr.msk.bf16.vlgmr.msra.gmra.mxu0 %vm231_vm3, %v527_v42 }
 0xb03   :  { %1051 = vmatpush3.bf16.msra.mxu0 %v1291_v4  ;;  %1054 = vmatprep.mubr.msk.bf16.mxu0 %vm1236_vm0, %v1235_v0 }
 0xb04   :  { %1052 = vmatprep.subr.bf16.mxu0 %v1235_v0 }
 0xb07   :  { %1053 = vmatpush3.bf16.msra.mxu0 %v1297_v6 }
 0xb08   :  { %1066 = vmatprep.subr.bf16.mxu0 %v1235_v0 }
 0xbc2   :  { %v565_v48 = vpop.f32.mrf.mxu0 }
 0xbc3   :  { %v571_v49 = vadd.f32 %v565_v48, %v192_v47 }
 0xbc4   :  { %v1040_v50 = vpop.f32.mrf.mxu0 }
 0xbc5   :  { %1129 = vtanh.f32 %v571_v49  ;;  %v936_v54 = vmul.f32 -1.442695, %v571_v49  ;;  %v203_v49 = vadd.f32 %v1380_v45, %v1320_v17 }
 0xbc6   :  { %v568_v51 = vpop.f32.mrf.mxu0 }
 0xbc7   :  { %1131 = vpow2.f32 %v936_v54 }
 0xbc8   :  { %v1041_v52 = vpop.f32.mrf.mxu0 }
 0xbd2   :  { %v1130_v53 = vpop.eup %1129 }
 0xbd3   :  { %581 = vrot.lane.b32.xlu0 %v1130_v53, %s1232_s24 }
 0xbd4   :  { %v1132_v55 = vpop.eup %1131 }
 0xbd5   :  { %v575_v56 = vadd.f32 1.0, %v1132_v55 }
 0xbd7   :  { %1133 = vrcp.f32 %v575_v56 }
 0xbe4   :  { %v1134_v57 = vpop.eup %1133 }
 0xbe5   :  { %v579_v60 = vmul.f32 %v1134_v57, %v515_v35 }
 0xc45   :  { %v582_v58 = vpop.permute.xlu0 %581 }
 0xc46   :  { %v584_v59 = vmul.f32 %v1134_v57, %v582_v58 }
 0xc48   :  { %586 = vrot.lane.b32.xlu1 %v584_v59, %s1238_s12 }
 0xcba   :  { %v587_v61 = vpop.permute.xlu1 %586 }
 0xcbb   :  { %v589_v62 = vadd.f32 %v587_v61, %v579_v60 }
 0xcbd   :  { %1135 = vtanh.f32 %v589_v62 }
 0xcca   :  { %v1136_v63 = vpop.eup %1135 }
 0xccb   :  { %592 = vrot.lane.b32.xlu0 %v1136_v63, %s1232_s24  ;;  %v1095_v63 = vld [vmem:[%s1432_s4 + $0x8] sm:$0xff]  }
 0xd3d   :  { %v593_v1 = vpop.permute.xlu0 %592 }
 0xd3e   :  { %v595_v2 = vmul.f32 %v1134_v57, %v593_v1  ;;  %v1096_v1 = vld [vmem:[%s1432_s4] sm:$0xff]   ;;  %s1239_s4 = smov [#allocation8]  }
 0xd3f   :  { %s902_s18 = sshll.u32 %s1239_s4, 4  ;;  %s903_s18 = int_to_ptr.vmem [resolvable:$true] %s902_s18 }
 0xd40   :  { %v598_v3 = vpack.c.bf16 %v595_v2, %v595_v2  ;;  %s1205_s19 = scalar_lea.vmem %s903_s18, 128  ;;  %p1210_p11 = scmp.lt.s32.totalorder %s903_s18, %s903_s18 }
 0xd41   :  { %p1206_p10 = scmp.ne.s32.totalorder %s903_s18, %s1205_s19  ;;  %p1211_p12 = scmp.lt.s32.totalorder %s1205_s19, %s1205_s19 }
 0xd42   :  { %600 = vrot.lane.b32.xlu1 %v598_v3, %s1238_s12 }
 0xd43   :  { %p1212_p13 = por %p1211_p12, %p1210_p11 }
 0xd45   :  { %p1213_p0 = pnand %p1212_p13, %p1206_p10 }
 0xdb4   :  { %v601_v5 = vpop.permute.xlu1 %600 }
 0xdb5   :  { %1047 = vmatmul.mubr.msk.bf16.vlgmr.msra.gmra.mxu1 %vm231_vm3, %v601_v5 }
 0xdb6   :  { %1059 = vmatpush3.bf16.msra.mxu1 %v1291_v4  ;;  %1062 = vmatprep.mubr.msk.bf16.mxu1 %vm1236_vm0, %v1235_v0 }
 0xdb7   :  { %1060 = vmatprep.subr.bf16.mxu1 %v1235_v0 }
 0xdba   :  { %1061 = vmatpush3.bf16.msra.mxu1 %v1297_v6 }
 0xe75   :  { %v639_v8 = vpop.f32.mrf.mxu1 }
 0xe76   :  { %v645_v9 = vadd.f32 %v639_v8, %v195_v7 }
 0xe77   :  { %v1048_v10 = vpop.f32.mrf.mxu1 }
 0xe78   :  { %1137 = vtanh.f32 %v645_v9  ;;  %v938_v14 = vmul.f32 -1.442695, %v645_v9  ;;  %v943_v9 = vld [vmem:[%s1433_s5] ss:$0 sm:$0xff] }
 0xe79   :  { %v642_v11 = vpop.f32.mrf.mxu1 }
 0xe7a   :  { %1139 = vpow2.f32 %v938_v14 }
 0xe7b   :  { %v1049_v12 = vpop.f32.mrf.mxu1 }
 0xe85   :  { %v1138_v13 = vpop.eup %1137 }
 0xe86   :  { %655 = vrot.lane.b32.xlu0 %v1138_v13, %s1232_s24 }
 0xe87   :  { %v1140_v4 = vpop.eup %1139 }
 0xe88   :  { %v649_v15 = vadd.f32 1.0, %v1140_v4 }
 0xe8a   :  { %1141 = vrcp.f32 %v649_v15 }
 0xe97   :  { %v1142_v16 = vpop.eup %1141 }
 0xe98   :  { %v653_v6 = vmul.f32 %v1142_v16, %v589_v62 }
 0xef8   :  { %v656_v18 = vpop.permute.xlu0 %655 }
 0xef9   :  { %v658_v19 = vmul.f32 %v1142_v16, %v656_v18 }
 0xefb   :  { %660 = vrot.lane.b32.xlu1 %v658_v19, %s1238_s12 }
 0xf6d   :  { %v661_v20 = vpop.permute.xlu1 %660 }
 0xf6e   :  { %v663_v21 = vadd.f32 %v661_v20, %v653_v6 }
 0xf70   :  { %1143 = vtanh.f32 %v663_v21 }
 0xf7d   :  { %v1144_v22 = vpop.eup %1143 }
 0xf7e   :  { %666 = vrot.lane.b32.xlu0 %v1144_v22, %s1232_s24 }
 0xff0   :  { %v667_v23 = vpop.permute.xlu0 %666 }
 0xff1   :  { %v669_v24 = vmul.f32 %v1142_v16, %v667_v23 }
 0xff3   :  { %v672_v25 = vpack.c.bf16 %v669_v24, %v669_v24 }
 0xff5   :  { %674 = vrot.lane.b32.xlu1 %v672_v25, %s1238_s12 }
0x1067   :  { %v675_v26 = vpop.permute.xlu1 %674 }
0x1068   :  { %1055 = vmatmul.mubr.msk.bf16.vlgmr.msra.gmra.mxu0 %vm231_vm3, %v675_v26 }
0x1069   :  { %1070 = vmatprep.mubr.msk.bf16.mxu0 %vm1236_vm0, %v1235_v0  ;;  %1067 = vmatpush3.bf16.msra.mxu0 %v1095_v63 }
0x106a   :  { %1068 = vmatprep.subr.bf16.mxu0 %v1235_v0 }
0x106d   :  { %1069 = vmatpush3.bf16.msra.mxu0 %v1096_v1 }
0x1128   :  { %v713_v28 = vpop.f32.mrf.mxu0 }
0x1129   :  { %v719_v29 = vadd.f32 %v713_v28, %v200_v27 }
0x112a   :  { %v1056_v30 = vpop.f32.mrf.mxu0 }
0x112b   :  { %1145 = vtanh.f32 %v719_v29  ;;  %v940_v34 = vmul.f32 -1.442695, %v719_v29 }
0x112c   :  { %v716_v31 = vpop.f32.mrf.mxu0 }
0x112d   :  { %1147 = vpow2.f32 %v940_v34 }
0x112e   :  { %v1057_v32 = vpop.f32.mrf.mxu0 }
0x1138   :  { %v1146_v33 = vpop.eup %1145 }
0x1139   :  { %729 = vrot.lane.b32.xlu0 %v1146_v33, %s1232_s24 }
0x113a   :  { %v1148_v35 = vpop.eup %1147 }
0x113b   :  { %v723_v36 = vadd.f32 1.0, %v1148_v35 }
0x113d   :  { %1149 = vrcp.f32 %v723_v36 }
0x114a   :  { %v1150_v37 = vpop.eup %1149 }
0x114b   :  { %v727_v40 = vmul.f32 %v1150_v37, %v663_v21 }
0x11ab   :  { %v730_v38 = vpop.permute.xlu0 %729 }
0x11ac   :  { %v732_v39 = vmul.f32 %v1150_v37, %v730_v38 }
0x11ae   :  { %734 = vrot.lane.b32.xlu1 %v732_v39, %s1238_s12 }
0x1220   :  { %v735_v41 = vpop.permute.xlu1 %734 }
0x1221   :  { %v737_v42 = vadd.f32 %v735_v41, %v727_v40 }
0x1223   :  { %1151 = vtanh.f32 %v737_v42 }
0x1230   :  { %v1152_v43 = vpop.eup %1151 }
0x1231   :  { %740 = vrot.lane.b32.xlu0 %v1152_v43, %s1232_s24 }
0x12a3   :  { %v741_v44 = vpop.permute.xlu0 %740 }
0x12a4   :  { %v743_v46 = vmul.f32 %v1150_v37, %v741_v44 }
0x12a6   :  { %v746_v47 = vpack.c.bf16 %v743_v46, %v743_v46 }
0x12a8   :  { %748 = vrot.lane.b32.xlu1 %v746_v47, %s1238_s12 }
0x131a   :  { %v749_v48 = vpop.permute.xlu1 %748 }
0x131b   :  { %1063 = vmatmul.mubr.msk.bf16.vlgmr.msra.gmra.mxu1 %vm231_vm3, %v749_v48 }
0x13db   :  { %v787_v50 = vpop.f32.mrf.mxu1 }
0x13dc   :  { %v793_v51 = vadd.f32 %v787_v50, %v203_v49 }
0x13dd   :  { %v1064_v52 = vpop.f32.mrf.mxu1 }
0x13de   :  { %1153 = vtanh.f32 %v793_v51  ;;  %v942_v56 = vmul.f32 -1.442695, %v793_v51 }
0x13df   :  { %v790_v53 = vpop.f32.mrf.mxu1 }
0x13e0   :  { %1155 = vpow2.f32 %v942_v56 }
0x13e1   :  { %v1065_v54 = vpop.f32.mrf.mxu1 }
0x13eb   :  { %v1154_v55 = vpop.eup %1153 }
0x13ec   :  { %803 = vrot.lane.b32.xlu0 %v1154_v55, %s1232_s24 }
0x13ed   :  { %v1156_v57 = vpop.eup %1155 }
0x13ee   :  { %v797_v58 = vadd.f32 1.0, %v1156_v57 }
0x13f0   :  { %1157 = vrcp.f32 %v797_v58 }
0x13fd   :  { %v1158_v59 = vpop.eup %1157 }
0x13fe   :  { %v801_v17 = vmul.f32 %v1158_v59, %v737_v42 }
0x145e   :  { %v804_v60 = vpop.permute.xlu0 %803 }
0x145f   :  { %v806_v61 = vmul.f32 %v1158_v59, %v804_v60 }
0x1461   :  { %808 = vrot.lane.b32.xlu1 %v806_v61, %s1238_s12 }
0x14d3   :  { %v809_v45 = vpop.permute.xlu1 %808 }
0x14d4   :  { %v811_v62 = vadd.f32 %v809_v45, %v801_v17 }
0x14d6   :  { %1159 = vtanh.f32 %v811_v62 }
0x14e3   :  { %v1160_v2 = vpop.eup %1159 }
0x14e4   :  { %814 = vrot.lane.b32.xlu0 %v1160_v2, %s1232_s24 }
0x1556   :  { %v815_v3 = vpop.permute.xlu0 %814 }
0x1557   :  { %v817_v5 = vmul.f32 %v1158_v59, %v815_v3 }
0x1559   :  { %v818_v7 = vpack.c.bf16 %v817_v5, %v817_v5 }
0x155b   :  { %831 = vrot.lane.b32.xlu1 %v818_v7, %s1238_s12 }
0x15cd   :  { %v832_v8 = vpop.permute.xlu1 %831 }
0x15ce   :  { %1071 = vmatmul.mubr.msk.bf16.vlgmr.msra.gmra.mxu0 %vm231_vm3, %v832_v8 }
0x168e   :  { %v882_v10 = vpop.f32.mrf.mxu0 }
0x168f   :  { %v883_v11 = vadd.f32 %v943_v9, %v882_v10 }
0x1690   :  { %v1072_v12 = vpop.f32.mrf.mxu0 }
0x1691   :  { %v947_v0 = vmul.f32 -1.442695, %v883_v11 }
0x1692   :  { %v885_v13 = vpop.f32.mrf.mxu0 }
0x1693   :  { %1161 = vpow2.f32 %v947_v0 }
0x1694   :  { %v1073_v14 = vpop.f32.mrf.mxu0 }
0x16a0   :  { %v1162_v4 = vpop.eup %1161 }
0x16a1   :  { %v891_v15 = vadd.f32 1.0, %v1162_v4 }
0x16a3   :  { %1163 = vrcp.f32 %v891_v15 }
0x16b0   :  { %v1164_v16 = vpop.eup %1163 }
0x16b1   :  { %895 = vst.msk [vmem:[#allocation8] sm:$0xff] %vm894_vm4, %v1164_v16 }
0x16b2   :  { %1216 = shalt.err (!%p1213_p0)
}
0x16b3   :  { %905 = dma.vmem_to_hbm [thread:$0]  %s903_s18, 128, %s1434_s6, [#allocation5]  }
0x16b4   :  { %1229 = dma.done.wait [#allocation5], 128  }
0x16b5   :  { %1230 = vsyncadd [#allocation5], 4294967168 }
0x16b6   :  { %909 = vsyncpa [#allocation4], 1 }
0x16b7   :  { %910 = vsyncpa [#allocation7], 1 }
0x16b8   :  { %911 = vsyncpa [#allocation5], 1 }

</bundles_post_ra>
